<compile_context>
chip_gen: v5e
topology: v5e:2x2
jax: 0.10.0
libtpu: 0.0.40
codegen_flags: <defaults>
</compile_context>

<pallas_src>
import jax
import jax.numpy as jnp
from jax import lax
from jax.experimental import pallas as pl
from jax.experimental.pallas import tpu as pltpu


def _pose_kernel(x_ref, y_ref, o_ref):
    # x_ref / y_ref : (TN, L) logits (any float dtype; cast in-kernel)
    # o_ref         : (TN, 3) f32 -> [argmax_x, argmax_y, min(max_prob_x, max_prob_y)]
    x = x_ref[...].astype(jnp.float32)
    y = y_ref[...].astype(jnp.float32)
    _, L = x.shape

    # Row-wise max (feeds both argmax and the stable max-softmax-prob).
    mx = jnp.max(x, axis=-1, keepdims=True)          # (TN, 1)
    my = jnp.max(y, axis=-1, keepdims=True)

    # argmax = first lane index equal to the row max (matches jnp/torch ties).
    # (1, L) iota broadcasts inside the where; no full-tile int32 intermediate.
    lane = lax.broadcasted_iota(jnp.int32, (1, L), 1)
    ax = jnp.min(jnp.where(x == mx, lane, L), axis=-1, keepdims=True)   # (TN, 1)
    ay = jnp.min(jnp.where(y == my, lane, L), axis=-1, keepdims=True)

    # max softmax prob = exp(max - max) / sum(exp(x - max)) = 1 / sum(exp(x - max)).
    sx = jnp.sum(jnp.exp(x - mx), axis=-1, keepdims=True)               # (TN, 1)
    sy = jnp.sum(jnp.exp(y - my), axis=-1, keepdims=True)
    pv = jnp.minimum(1.0 / sx, 1.0 / sy)   # mask/assign in torch == elementwise min

    # Fused (TN, 3) output block: one output DMA per grid step.
    o_ref[:, 0:1] = ax.astype(jnp.float32)
    o_ref[:, 1:2] = ay.astype(jnp.float32)
    o_ref[:, 2:3] = pv


def post_process_pose_dr(outputs, *, max_tile_rows=1024):
    """JAX/Pallas equivalent of PostProcessPoseDR.forward (results arg unused)."""
    x_coord = outputs["x_coord"]
    y_coord = outputs["y_coord"]
    B, Q, K, L = x_coord.shape
    N = B * Q * K

    # Keep native dtype (bf16 stays bf16); cast happens inside the kernel.
    x2 = x_coord.reshape(N, L)
    y2 = y_coord.reshape(N, L)

    itemsize = jnp.dtype(x2.dtype).itemsize
    sub = 16 if itemsize < 4 else 8   # sublane packing (bf16 packs 16 rows / vreg)

    # Pick the row tile: ~2 MiB per input block (x2 inputs x2 pipeline buffers
    # plus a few full-size intermediates stays far below every chip's scoped
    # VMEM default), capped at max_tile_rows and at the problem size.
    target_block_bytes = 2 * 1024 * 1024
    tn = min(max_tile_rows, max(sub, target_block_bytes // max(1, L * itemsize)))
    tn = max(sub, (tn // sub) * sub)
    if N <= tn:
        # Tiny problem: single grid step, rounded up to the sublane multiple.
        tn = max(sub, -(-N // sub) * sub)

    # Pad N up to a multiple of the tile; padded rows are zeros (softmax of a
    # zero row is well defined) and are stripped after the kernel.
    n_pad = -(-N // tn) * tn
    if n_pad != N:
        pad = ((0, n_pad - N), (0, 0))
        x2 = jnp.pad(x2, pad)
        y2 = jnp.pad(y2, pad)

    grid = (n_pad // tn,)
    in_spec = pl.BlockSpec((tn, L), lambda i: (i, 0))
    out_spec = pl.BlockSpec((tn, 3), lambda i: (i, 0))

    cost = pl.CostEstimate(
        flops=8 * n_pad * L,
        transcendentals=2 * n_pad * L,
        bytes_accessed=2 * n_pad * L * itemsize + n_pad * 3 * 4,
    )

    out = pl.pallas_call(
        _pose_kernel,
        out_shape=jax.ShapeDtypeStruct((n_pad, 3), jnp.float32),
        grid_spec=pltpu.PrefetchScalarGridSpec(
            num_scalar_prefetch=0,
            grid=grid,
            in_specs=[in_spec, in_spec],
            out_specs=out_spec,
        ),
        compiler_params=pltpu.CompilerParams(
            dimension_semantics=("parallel",),   # lets v7x split rows across its 2 TCs
        ),
        cost_estimate=cost,
    )(x2, y2)

    # Strip padding; the reshape to (B, Q, K, 3) is free metadata.
    return out[:N].reshape(B, Q, K, 3)


def _reference(outputs):
    """Pure-JAX reference mirroring the torch code."""
    x = outputs["x_coord"].astype(jnp.float32)
    y = outputs["y_coord"].astype(jnp.float32)
    prob_x = jax.nn.softmax(x, axis=-1)
    prob_y = jax.nn.softmax(y, axis=-1)
    max_val_x = jnp.max(prob_x, axis=-1)
    max_val_y = jnp.max(prob_y, axis=-1)
    preds_x = jnp.argmax(prob_x, axis=-1)
    preds_y = jnp.argmax(prob_y, axis=-1)
    max_val = jnp.where(max_val_x > max_val_y, max_val_y, max_val_x)
    pose = jnp.stack(
        [preds_x.astype(jnp.float32), preds_y.astype(jnp.float32), max_val],
        axis=-1,
    )
    return pose


if __name__ == "__main__":
    # Small shapes consistent with the module: [B, num_queries, num_keypoints, num_bins]
    B, Q, K, L = 2, 4, 8, 128
    key = jax.random.PRNGKey(0)
    kx, ky = jax.random.split(key)
    x_coord = jax.random.normal(kx, (B, Q, K, L), dtype=jnp.float32)
    y_coord = jax.random.normal(ky, (B, Q, K, L), dtype=jnp.float32)

    outputs = {"x_coord": x_coord, "y_coord": y_coord}

    pose = post_process_pose_dr(outputs)
    pose = jax.block_until_ready(pose)

    ref = _reference(outputs)
    assert pose.shape == (B, Q, K, 3), pose.shape
    assert jnp.allclose(pose[..., 0], ref[..., 0]), "argmax x mismatch"
    assert jnp.allclose(pose[..., 1], ref[..., 1]), "argmax y mismatch"
    assert jnp.allclose(pose[..., 2], ref[..., 2], atol=1e-6), "max prob mismatch"

    print("KERNEL_OK")
</pallas_src>

<mosaic_0001>
module attributes {stable_mosaic.version = 11 : i64} {
  func.func @_pose_kernel(%arg0: i32, %arg1: memref<64x128xf32, #tpu.memory_space<vmem>>, %arg2: memref<64x128xf32, #tpu.memory_space<vmem>>, %arg3: memref<64x3xf32, #tpu.memory_space<vmem>>) attributes {dimension_semantics = [#tpu.dimension_semantics<parallel>], iteration_bounds = array<i64: 1>, scalar_prefetch = 0 : i64, scratch_operands = 0 : i64, tpu.core_type = #tpu.core_type<tc>, window_params = [{transform_indices = @transform_0, window_bounds = array<i64: 64, 128>}, {transform_indices = @transform_1, window_bounds = array<i64: 64, 128>}, {transform_indices = @transform_2, window_bounds = array<i64: 64, 3>}]} {
    %c0 = arith.constant 0 : index
    %c0_0 = arith.constant 0 : index
    %0 = vector.load %arg1[%c0, %c0_0] : memref<64x128xf32, #tpu.memory_space<vmem>>, vector<64x128xf32>
    %c0_1 = arith.constant 0 : index
    %c0_2 = arith.constant 0 : index
    %1 = vector.load %arg2[%c0_1, %c0_2] : memref<64x128xf32, #tpu.memory_space<vmem>>, vector<64x128xf32>
    %cst = arith.constant dense<0xFF800000> : vector<64xf32>
    %2 = vector.multi_reduction <maximumf>, %0, %cst [1] : vector<64x128xf32> to vector<64xf32>
    %3 = vector.shape_cast %2 : vector<64xf32> to vector<64x1xf32>
    %cst_3 = arith.constant dense<0xFF800000> : vector<64xf32>
    %4 = vector.multi_reduction <maximumf>, %1, %cst_3 [1] : vector<64x128xf32> to vector<64xf32>
    %5 = vector.shape_cast %4 : vector<64xf32> to vector<64x1xf32>
    %6 = tpu.iota {dimensions = array<i32: 1>} : vector<1x128xi32>
    %7 = vector.broadcast %3 : vector<64x1xf32> to vector<64x128xf32>
    %8 = arith.cmpf oeq, %0, %7 : vector<64x128xf32>
    %c128_i32 = arith.constant 128 : i32
    %9 = vector.shape_cast %6 : vector<1x128xi32> to vector<1x128xi32>
    %10 = vector.broadcast %9 : vector<1x128xi32> to vector<64x128xi32>
    %11 = vector.broadcast %c128_i32 : i32 to vector<64x128xi32>
    %12 = arith.select %8, %10, %11 : vector<64x128xi1>, vector<64x128xi32>
    %cst_4 = arith.constant dense<2147483647> : vector<64xi32>
    %13 = vector.multi_reduction <minsi>, %12, %cst_4 [1] : vector<64x128xi32> to vector<64xi32>
    %14 = vector.shape_cast %13 : vector<64xi32> to vector<64x1xi32>
    %15 = vector.broadcast %5 : vector<64x1xf32> to vector<64x128xf32>
    %16 = arith.cmpf oeq, %1, %15 : vector<64x128xf32>
    %c128_i32_5 = arith.constant 128 : i32
    %17 = vector.shape_cast %6 : vector<1x128xi32> to vector<1x128xi32>
    %18 = vector.broadcast %17 : vector<1x128xi32> to vector<64x128xi32>
    %19 = vector.broadcast %c128_i32_5 : i32 to vector<64x128xi32>
    %20 = arith.select %16, %18, %19 : vector<64x128xi1>, vector<64x128xi32>
    %cst_6 = arith.constant dense<2147483647> : vector<64xi32>
    %21 = vector.multi_reduction <minsi>, %20, %cst_6 [1] : vector<64x128xi32> to vector<64xi32>
    %22 = vector.shape_cast %21 : vector<64xi32> to vector<64x1xi32>
    %23 = vector.broadcast %3 : vector<64x1xf32> to vector<64x128xf32>
    %24 = arith.subf %0, %23 : vector<64x128xf32>
    %25 = math.exp %24 : vector<64x128xf32>
    %cst_7 = arith.constant dense<0.000000e+00> : vector<64xf32>
    %26 = vector.multi_reduction <add>, %25, %cst_7 [1] : vector<64x128xf32> to vector<64xf32>
    %27 = vector.shape_cast %26 : vector<64xf32> to vector<64x1xf32>
    %28 = vector.broadcast %5 : vector<64x1xf32> to vector<64x128xf32>
    %29 = arith.subf %1, %28 : vector<64x128xf32>
    %30 = math.exp %29 : vector<64x128xf32>
    %cst_8 = arith.constant dense<0.000000e+00> : vector<64xf32>
    %31 = vector.multi_reduction <add>, %30, %cst_8 [1] : vector<64x128xf32> to vector<64xf32>
    %32 = vector.shape_cast %31 : vector<64xf32> to vector<64x1xf32>
    %cst_9 = arith.constant 1.000000e+00 : f32
    %33 = vector.broadcast %cst_9 : f32 to vector<64x1xf32>
    %34 = arith.divf %33, %27 : vector<64x1xf32>
    %cst_10 = arith.constant 1.000000e+00 : f32
    %35 = vector.broadcast %cst_10 : f32 to vector<64x1xf32>
    %36 = arith.divf %35, %32 : vector<64x1xf32>
    %37 = arith.minimumf %34, %36 : vector<64x1xf32>
    %38 = arith.sitofp %14 : vector<64x1xi32> to vector<64x1xf32>
    %c0_11 = arith.constant 0 : index
    %c0_12 = arith.constant 0 : index
    %39 = vector.load %arg3[%c0_11, %c0_12] : memref<64x3xf32, #tpu.memory_space<vmem>>, vector<64x1xf32>
    tpu.vector_store %arg3[%c0_11, %c0_12], %38 {strides = array<i32>} : memref<64x3xf32, #tpu.memory_space<vmem>>, vector<64x1xf32>,
    %40 = arith.sitofp %22 : vector<64x1xi32> to vector<64x1xf32>
    %c0_13 = arith.constant 0 : index
    %c1 = arith.constant 1 : index
    %41 = vector.load %arg3[%c0_13, %c1] : memref<64x3xf32, #tpu.memory_space<vmem>>, vector<64x1xf32>
    tpu.vector_store %arg3[%c0_13, %c1], %40 {strides = array<i32>} : memref<64x3xf32, #tpu.memory_space<vmem>>, vector<64x1xf32>,
    %c0_14 = arith.constant 0 : index
    %c2 = arith.constant 2 : index
    %42 = vector.load %arg3[%c0_14, %c2] : memref<64x3xf32, #tpu.memory_space<vmem>>, vector<64x1xf32>
    tpu.vector_store %arg3[%c0_14, %c2], %37 {strides = array<i32>} : memref<64x3xf32, #tpu.memory_space<vmem>>, vector<64x1xf32>,
    return
  }
  func.func @transform_0(%arg0: i32) -> (i32, i32) {
    %c0_i32 = arith.constant 0 : i32
    %c0_i32_0 = arith.constant 0 : i32
    return %arg0, %c0_i32 : i32, i32
  }
  func.func @transform_1(%arg0: i32) -> (i32, i32) {
    %c0_i32 = arith.constant 0 : i32
    %c0_i32_0 = arith.constant 0 : i32
    return %arg0, %c0_i32 : i32, i32
  }
  func.func @transform_2(%arg0: i32) -> (i32, i32) {
    %c0_i32 = arith.constant 0 : i32
    %c0_i32_0 = arith.constant 0 : i32
    return %arg0, %c0_i32 : i32, i32
  }
}

</mosaic_0001>

<bundles_post_ra>
// kernel: tpu_custom_call.1
= control target key start
LH: loop header
LB: loop body
LE: loop exit
PB: predicated region body
PF: predicated region fallthrough
CT: control target
= control target key end

     0   :  { %7 = vsyncpa [#allocation3], 0  ;;  %s1867_s0 = inlined_call_operand.hbm [shape: f32[64,128], index: 0, kind: input, shape index: {}]   ;;  %s1868_s1 = inlined_call_operand.hbm [shape: f32[64,128], index: 1, kind: input, shape index: {}]   ;;  %s1869_s2 = inlined_call_operand.vmem [shape: f32[64,3], index: 2, kind: output, shape index: {}]  }
   0x1   :  { %s13_s11 = sshll.u32 %s1867_s0, 4  ;;  %s14_s11 = int_to_ptr.hbm [resolvable:$true] %s13_s11 }
   0x2   :  { %8 = vsyncpa [#allocation5], 0  ;;  %s846_s12 = smov [#allocation2]   ;;  %s26_s16 = sshll.u32 %s1868_s1, 4  ;;  %s27_s16 = int_to_ptr.hbm [resolvable:$true] %s26_s16 }
   0x3   :  { %s15_s13 = sshll.u32 %s846_s12, 4  ;;  %s847_s17 = smov 128   ;;  %s16_s13 = int_to_ptr.vmem [resolvable:$true] %s15_s13 }
   0x4   :  { %s848_s18 = smov 8   ;;  %s849_s19 = smov [#allocation4]  }
   0x5   :  { %21 = dma.hbm_to_vmem [thread:$0]  %s14_s11, 1024, %s16_s13, [#allocation3], %s847_s17, %s847_s17, %s848_s18  }
   0x6   :  { %s28_s20 = sshll.u32 %s849_s19, 4  ;;  %s29_s20 = int_to_ptr.vmem [resolvable:$true] %s28_s20 }
   0x7   :  { %34 = dma.hbm_to_vmem [thread:$0]  %s27_s16, 1024, %s29_s20, [#allocation5], %s847_s17, %s847_s17, %s848_s18  }
   0x8   :  { %842 = dma.done.wait [#allocation3], 1024  }
   0x9   :  { %843 = vsyncadd [#allocation3], 4294966272 }
   0xa   :  { %844 = dma.done.wait [#allocation5], 1024  }
   0xb   :  { %845 = vsyncadd [#allocation5], 4294966272  ;;  %v871_v0 = vld [vmem:[#allocation2 + $0x20] sm:$0xff]  ;;  %v873_v1 = vld [vmem:[#allocation2 + $0x10] sm:$0xff]  ;;  %v91_v16 = vlaneseq }
   0xc   :  { %v875_v2 = vld [vmem:[#allocation2] sm:$0xff]  ;;  %67 = vmax.xlane.f32.xlu2 %v871_v0  ;;  %63 = vmax.xlane.f32.xlu1 %v873_v1  ;;  %v880_v3 = vld [vmem:[#allocation2 + $0x28] sm:$0xff]  ;;  %v882_v4 = vld [vmem:[#allocation2 + $0x18] sm:$0xff] }
   0xd   :  { %59 = vmax.xlane.f32.xlu0 %v875_v2  ;;  %v884_v5 = vld [vmem:[#allocation2 + $0x8] sm:$0xff]  ;;  %v889_v6 = vld [vmem:[#allocation4] sm:$0xff]  ;;  %v891_v7 = vld [vmem:[#allocation2 + $0x38] sm:$0xff]  ;;  %v919_v17 = vand.u32 127, %v91_v16 }
   0xe   :  { %v893_v8 = vld [vmem:[#allocation2 + $0x30] sm:$0xff]  ;;  %v900_v10 = vld [vmem:[#allocation4 + $0x18] sm:$0xff]  ;;  %v902_v11 = vld [vmem:[#allocation4 + $0x8] sm:$0xff] }
   0xf   :  { %v898_v9 = vld [vmem:[#allocation4 + $0x10] sm:$0xff]  ;;  %v907_v12 = vld [vmem:[#allocation4 + $0x28] sm:$0xff]  ;;  %v911_v14 = vld [vmem:[#allocation4 + $0x20] sm:$0xff] }
  0x10   :  { %v909_v13 = vld [vmem:[#allocation4 + $0x30] sm:$0xff]  ;;  %v916_v15 = vld [vmem:[#allocation4 + $0x38] sm:$0xff] }
  0x14   :  { %69 = vmax.xlane.f32.xlu2 %v880_v3  ;;  %65 = vmax.xlane.f32.xlu1 %v882_v4 }
  0x15   :  { %61 = vmax.xlane.f32.xlu0 %v884_v5 }
  0x1c   :  { %75 = vmax.xlane.f32.xlu2 %v889_v6  ;;  %73 = vmax.xlane.f32.xlu1 %v891_v7 }
  0x1d   :  { %71 = vmax.xlane.f32.xlu0 %v893_v8 }
  0x24   :  { %79 = vmax.xlane.f32.xlu1 %v898_v9  ;;  %81 = vmax.xlane.f32.xlu2 %v900_v10 }
  0x25   :  { %77 = vmax.xlane.f32.xlu0 %v902_v11 }
  0x2c   :  { %85 = vmax.xlane.f32.xlu1 %v907_v12  ;;  %87 = vmax.xlane.f32.xlu2 %v909_v13 }
  0x2d   :  { %83 = vmax.xlane.f32.xlu0 %v911_v14 }
  0x35   :  { %89 = vmax.xlane.f32.xlu0 %v916_v15 }
  0x7f   :  { %v921_v18 = vpop.xlane.xlu2 %67  ;;  %v923_v19 = vpop.xlane.xlu1 %63 }
  0x80   :  { %vm95_vm0 = vcmp.eq.f32.partialorder %v873_v1, %v923_v19  ;;  %v927_v20 = vpop.xlane.xlu0 %59  ;;  %vm97_vm5 = vcmp.eq.f32.partialorder %v871_v0, %v921_v18  ;;  %v351_v16 = vsub.f32 %v873_v1, %v923_v19 }
  0x81   :  { %v930_v21 = vsel %vm95_vm0, %v919_v17, 128  ;;  %vm93_vm1 = vcmp.eq.f32.partialorder %v875_v2, %v927_v20  ;;  %v978_v39 = vsel %vm97_vm5, %v919_v17, 128 }
  0x82   :  { %v935_v22 = vsel %vm93_vm1, %v919_v17, 128  ;;  %v138_v23 = vshra.s32 %v930_v21, 16  ;;  %v166_v44 = vshra.s32 %v978_v39, 16 }
  0x83   :  { %v110_v24 = vshra.s32 %v935_v22, 16 }
  0x84   :  { %v939_v25 = vcvt.s32.f32 %v138_v23  ;;  %v1009_v50 = vcvt.s32.f32 %v166_v44  ;;  %v361_v44 = vmul.f32 1.442695, %v351_v16 }
  0x85   :  { %v941_v26 = vcvt.s32.f32 %v110_v24 }
  0x86   :  { %141 = vmin.xlane.f32.xlu2 %v939_v25  ;;  %730 = vpow2.f32 %v361_v44 }
  0x87   :  { %113 = vmin.xlane.f32.xlu1 %v941_v26  ;;  %v945_v27 = vpop.xlane.xlu2 %69  ;;  %v947_v28 = vpop.xlane.xlu1 %65 }
  0x88   :  { %vm98_vm2 = vcmp.eq.f32.partialorder %v880_v3, %v945_v27  ;;  %vm96_vm3 = vcmp.eq.f32.partialorder %v882_v4, %v947_v28  ;;  %v953_v29 = vpop.xlane.xlu0 %61  ;;  %v354_v16 = vsub.f32 %v880_v3, %v945_v27 }
  0x89   :  { %v956_v30 = vsel %vm98_vm2, %v919_v17, 128  ;;  %v959_v31 = vsel %vm96_vm3, %v919_v17, 128  ;;  %vm94_vm4 = vcmp.eq.f32.partialorder %v884_v5, %v953_v29 }
  0x8a   :  { %v964_v32 = vsel %vm94_vm4, %v919_v17, 128  ;;  %v180_v33 = vshra.s32 %v956_v30, 16  ;;  %v152_v34 = vshra.s32 %v959_v31, 16  ;;  %v367_v44 = vmul.f32 1.442695, %v354_v16 }
  0x8b   :  { %v124_v35 = vshra.s32 %v964_v32, 16 }
  0x8c   :  { %v971_v36 = vcvt.s32.f32 %v180_v33  ;;  %v973_v37 = vcvt.s32.f32 %v152_v34 }
  0x8d   :  { %v975_v38 = vcvt.s32.f32 %v124_v35 }
  0x8e   :  { %183 = vmin.xlane.f32.xlu2 %v971_v36 }
  0x8f   :  { %155 = vmin.xlane.f32.xlu1 %v973_v37  ;;  %127 = vmin.xlane.f32.xlu0 %v975_v38  ;;  %v983_v40 = vpop.xlane.xlu2 %75  ;;  %v985_v41 = vpop.xlane.xlu1 %73 }
  0x90   :  { %vm221_vm6 = vcmp.eq.f32.partialorder %v889_v6, %v983_v40  ;;  %v989_v42 = vpop.xlane.xlu0 %71  ;;  %vm100_vm7 = vcmp.eq.f32.partialorder %v891_v7, %v985_v41 }
  0x91   :  { %v992_v43 = vsel %vm221_vm6, %v919_v17, 128  ;;  %vm99_vm8 = vcmp.eq.f32.partialorder %v893_v8, %v989_v42  ;;  %v1005_v48 = vsel %vm100_vm7, %v919_v17, 128 }
  0x92   :  { %v1000_v45 = vsel %vm99_vm8, %v919_v17, 128  ;;  %v238_v46 = vshra.s32 %v992_v43, 16  ;;  %v208_v53 = vshra.s32 %v1005_v48, 16 }
  0x93   :  { %v194_v47 = vshra.s32 %v1000_v45, 16 }
  0x94   :  { %v1007_v49 = vcvt.s32.f32 %v238_v46  ;;  %v1036_v59 = vcvt.s32.f32 %v208_v53 }
  0x95   :  { %v1011_v51 = vcvt.s32.f32 %v194_v47 }
  0x96   :  { %241 = vmin.xlane.f32.xlu2 %v1007_v49 }
  0x97   :  { %169 = vmin.xlane.f32.xlu0 %v1009_v50  ;;  %197 = vmin.xlane.f32.xlu1 %v1011_v51  ;;  %v1016_v52 = vpop.xlane.xlu1 %79  ;;  %v1019_v54 = vpop.xlane.xlu2 %81 }
  0x98   :  { %vm223_vm9 = vcmp.eq.f32.partialorder %v898_v9, %v1016_v52  ;;  %v1023_v55 = vpop.xlane.xlu0 %77  ;;  %vm224_vm11 = vcmp.eq.f32.partialorder %v900_v10, %v1019_v54 }
  0x99   :  { %v1026_v56 = vsel %vm223_vm9, %v919_v17, 128  ;;  %vm222_vm10 = vcmp.eq.f32.partialorder %v902_v11, %v1023_v55  ;;  %v1042_v62 = vsel %vm224_vm11, %v919_v17, 128 }
  0x9a   :  { %v1033_v57 = vsel %vm222_vm10, %v919_v17, 128  ;;  %v266_v58 = vshra.s32 %v1026_v56, 16  ;;  %1874 = vst [vmem:[#allocation8_spill] sm:$0xff] %v1042_v62  ;;  %v280_v24 = vshra.s32 %v1042_v62, 16  ;;  %v349_v62 = vsub.f32 %v875_v2, %v927_v20 }
  0x9b   :  { %v252_v60 = vshra.s32 %v1033_v57, 16 }
  0x9c   :  { %v1039_v61 = vcvt.s32.f32 %v266_v58  ;;  %v1071_v46 = vcvt.s32.f32 %v280_v24  ;;  %v357_v2 = vmul.f32 1.442695, %v349_v62 }
  0x9d   :  { %v1044_v63 = vcvt.s32.f32 %v252_v60 }
  0x9e   :  { %269 = vmin.xlane.f32.xlu2 %v1039_v61  ;;  %732 = vpow2.f32 %v357_v2 }
  0x9f   :  { %211 = vmin.xlane.f32.xlu0 %v1036_v59  ;;  %255 = vmin.xlane.f32.xlu1 %v1044_v63  ;;  %v1051_v23 = vpop.xlane.xlu1 %85  ;;  %v1054_v33 = vpop.xlane.xlu2 %87  ;;  %734 = vpow2.f32 %v367_v44 }
  0xa0   :  { %vm226_vm12 = vcmp.eq.f32.partialorder %v907_v12, %v1051_v23  ;;  %v1058_v34 = vpop.xlane.xlu0 %83  ;;  %vm227_vm14 = vcmp.eq.f32.partialorder %v909_v13, %v1054_v33 }
  0xa1   :  { %v1061_v35 = vsel %vm226_vm12, %v919_v17, 128  ;;  %vm225_vm13 = vcmp.eq.f32.partialorder %v911_v14, %v1058_v34  ;;  %v1077_v58 = vsel %vm227_vm14, %v919_v17, 128 }
  0xa2   :  { %1875 = vst [vmem:[#allocation9_spill] sm:$0xff] %v1061_v35  ;;  %v1068_v1 = vsel %vm225_vm13, %v919_v17, 128  ;;  %v308_v19 = vshra.s32 %v1061_v35, 16  ;;  %v322_v24 = vshra.s32 %v1077_v58, 16  ;;  %v731_v35 = vpop.eup %730 }
  0xa3   :  { %v294_v47 = vshra.s32 %v1068_v1, 16  ;;  %1877 = vst [vmem:[#allocation11_spill] sm:$0xff] %v1077_v58 }
  0xa4   :  { %v1074_v53 = vcvt.s32.f32 %v308_v19  ;;  %v350_v19 = vsub.f32 %v884_v5, %v953_v29  ;;  %v1098_v3 = vcvt.s32.f32 %v322_v24  ;;  %v353_v5 = vsub.f32 %v871_v0, %v921_v18  ;;  %v733_v24 = vpop.eup %732 }
  0xa5   :  { %v1079_v60 = vcvt.s32.f32 %v294_v47  ;;  %v389_v29 = vsub.f32 %v889_v6, %v983_v40  ;;  %v356_v18 = vsub.f32 %v891_v7, %v985_v41  ;;  %v392_v6 = vsub.f32 %v900_v10, %v1019_v54 }
  0xa6   :  { %1876 = vst [vmem:[#allocation10_spill] sm:$0xff] %v1074_v53  ;;  %311 = vmin.xlane.f32.xlu2 %v1074_v53  ;;  %v359_v53 = vmul.f32 1.442695, %v350_v19  ;;  %v365_v62 = vmul.f32 1.442695, %v353_v5  ;;  %v391_v7 = vsub.f32 %v898_v9, %v1016_v52  ;;  %v395_v10 = vsub.f32 %v909_v13, %v1054_v33 }
  0xa7   :  { %283 = vmin.xlane.f32.xlu0 %v1071_v46  ;;  %297 = vmin.xlane.f32.xlu1 %v1079_v60  ;;  %v397_v16 = vmul.f32 1.442695, %v389_v29  ;;  %v403_v40 = vmul.f32 1.442695, %v392_v6  ;;  %v394_v9 = vsub.f32 %v907_v12, %v1051_v23  ;;  %v393_v13 = vsub.f32 %v911_v14, %v1058_v34 }
  0xa8   :  { %v1091_v47 = vpop.xlane.xlu0 %89  ;;  %736 = vpow2.f32 %v359_v53  ;;  %v401_v41 = vmul.f32 1.442695, %v391_v7  ;;  %v137_v34 = vand.u32 65535, %v930_v21  ;;  %v179_v21 = vand.u32 65535, %v956_v30 }
  0xa9   :  { %vm228_vm15 = vcmp.eq.f32.partialorder %v916_v15, %v1091_v47  ;;  %738 = vpow2.f32 %v365_v62  ;;  %v407_v52 = vmul.f32 1.442695, %v394_v9  ;;  %v396_v12 = vsub.f32 %v916_v15, %v1091_v47 }
  0xaa   :  { %v1096_v20 = vsel %vm228_vm15, %v919_v17, 128  ;;  %v352_v17 = vsub.f32 %v882_v4, %v947_v28  ;;  %740 = vpow2.f32 %v397_v16  ;;  %v355_v4 = vsub.f32 %v893_v8, %v989_v42 }
  0xab   :  { %v336_v27 = vshra.s32 %v1096_v20, 16  ;;  %v371_v28 = vmul.f32 1.442695, %v356_v18  ;;  %v390_v8 = vsub.f32 %v902_v11, %v1023_v55  ;;  %v409_v42 = vmul.f32 1.442695, %v395_v10 }
  0xac   :  { %v363_v19 = vmul.f32 1.442695, %v352_v17  ;;  %v369_v53 = vmul.f32 1.442695, %v355_v4  ;;  %v405_v55 = vmul.f32 1.442695, %v393_v13 }
  0xad   :  { %v1101_v58 = vcvt.s32.f32 %v336_v27  ;;  %v735_v27 = vpop.eup %734  ;;  %v399_v5 = vmul.f32 1.442695, %v390_v8  ;;  %v411_v23 = vmul.f32 1.442695, %v396_v12  ;;  %v123_v4 = vand.u32 65535, %v964_v32  ;;  %v1879_v12 = vld [vmem:[#allocation11_spill] sm:$0xff] }
  0xae   :  { %377 = vadd.xlane.f32.xlu2 %v731_v35  ;;  %v737_v0 = vpop.eup %736  ;;  %742 = vpow2.f32 %v363_v19  ;;  %v109_v19 = vand.u32 65535, %v935_v22  ;;  %v151_v22 = vand.u32 65535, %v959_v31  ;;  %v237_v32 = vand.u32 65535, %v992_v43 }
  0xaf   :  { %325 = vmin.xlane.f32.xlu0 %v1098_v3  ;;  %339 = vmin.xlane.f32.xlu1 %v1101_v58  ;;  %v739_v35 = vpop.eup %738  ;;  %744 = vpow2.f32 %v371_v28  ;;  %v125_v30 = vcvt.s32.f32 %v123_v4  ;;  %v165_v7 = vand.u32 65535, %v978_v39 }
  0xb0   :  { %v741_v2 = vpop.eup %740  ;;  %746 = vpow2.f32 %v403_v40  ;;  %v111_v6 = vcvt.s32.f32 %v109_v19  ;;  %v181_v40 = vcvt.s32.f32 %v179_v21  ;;  %v239_v10 = vcvt.s32.f32 %v237_v32 }
  0xb1   :  { %748 = vpow2.f32 %v369_v53  ;;  %v167_v43 = vcvt.s32.f32 %v165_v7 }
  0xb2   :  { %750 = vpow2.f32 %v401_v41 }
  0xb3   :  { %752 = vpow2.f32 %v409_v42 }
  0xb4   :  { %v743_v44 = vpop.eup %742  ;;  %754 = vpow2.f32 %v399_v5  ;;  %v207_v5 = vand.u32 65535, %v1005_v48 }
  0xb5   :  { %v745_v54 = vpop.eup %744  ;;  %756 = vpow2.f32 %v407_v52  ;;  %v1878_v52 = vld [vmem:[#allocation8_spill] sm:$0xff] }
  0xb6   :  { %383 = vadd.xlane.f32.xlu2 %v735_v27  ;;  %v747_v29 = vpop.eup %746  ;;  %758 = vpow2.f32 %v405_v55 }
  0xb7   :  { %373 = vadd.xlane.f32.xlu0 %v733_v24  ;;  %375 = vadd.xlane.f32.xlu1 %v737_v0  ;;  %v749_v17 = vpop.eup %748  ;;  %760 = vpow2.f32 %v411_v23  ;;  %v139_v0 = vcvt.s32.f32 %v137_v34  ;;  %v321_v23 = vand.u32 65535, %v1879_v12 }
  0xb8   :  { %v751_v11 = vpop.eup %750 }
  0xb9   :  { %v753_v33 = vpop.eup %752 }
  0xba   :  { %v755_v62 = vpop.eup %754 }
  0xbb   :  { %v757_v16 = vpop.eup %756 }
  0xbc   :  { %v759_v24 = vpop.eup %758 }
  0xbd   :  { %v761_v14 = vpop.eup %760 }
  0xbe   :  { %413 = vadd.xlane.f32.xlu2 %v741_v2 }
  0xbf   :  { %379 = vadd.xlane.f32.xlu0 %v743_v44  ;;  %381 = vadd.xlane.f32.xlu1 %v739_v35  ;;  %v193_v44 = vand.u32 65535, %v1000_v45  ;;  %v265_v45 = vand.u32 65535, %v1026_v56  ;;  %v209_v56 = vcvt.s32.f32 %v207_v5 }
  0xc1   :  { %v195_v41 = vcvt.s32.f32 %v193_v44 }
  0xc6   :  { %419 = vadd.xlane.f32.xlu2 %v747_v29  ;;  %v267_v29 = vcvt.s32.f32 %v265_v45 }
  0xc7   :  { %385 = vadd.xlane.f32.xlu0 %v749_v17  ;;  %387 = vadd.xlane.f32.xlu1 %v745_v54  ;;  %v251_v54 = vand.u32 65535, %v1033_v57  ;;  %v293_v57 = vand.u32 65535, %v1068_v1  ;;  %v335_v1 = vand.u32 65535, %v1096_v20 }
  0xc9   :  { %v253_v9 = vcvt.s32.f32 %v251_v54 }
  0xce   :  { %425 = vadd.xlane.f32.xlu2 %v753_v33  ;;  %v295_v33 = vcvt.s32.f32 %v293_v57 }
  0xcf   :  { %415 = vadd.xlane.f32.xlu0 %v755_v62  ;;  %417 = vadd.xlane.f32.xlu1 %v751_v11  ;;  %v279_v11 = vand.u32 65535, %v1878_v52 }
  0xd7   :  { %421 = vadd.xlane.f32.xlu0 %v759_v24  ;;  %423 = vadd.xlane.f32.xlu1 %v757_v16  ;;  %v1880_v24 = vld [vmem:[#allocation9_spill] sm:$0xff] }
  0xdf   :  { %427 = vadd.xlane.f32.xlu0 %v761_v14  ;;  %v307_v14 = vand.u32 65535, %v1880_v24 }
  0xf9   :  { %v1131_v27 = vpop.xlane.xlu2 %141 }
  0xfa   :  { %v1133_v18 = vpop.xlane.xlu1 %113  ;;  %vm143_vm0 = vcmp.eq.f32.partialorder %v939_v25, %v1131_v27  ;;  %v153_v25 = vcvt.s32.f32 %v151_v22 }
  0xfb   :  { %vm115_vm1 = vcmp.eq.f32.partialorder %v941_v26, %v1133_v18  ;;  %v144_v15 = vsel %vm143_vm0, %v139_v0, inf  ;;  %v1881_v0 = vld [vmem:[#allocation10_spill] sm:$0xff]  ;;  %v120_v32 = vcvt.f32.s32 %v1133_v18 }
  0xfc   :  { %v116_v47 = vsel %vm115_vm1, %v111_v6, inf  ;;  %145 = vmin.xlane.f32.xlu0 %v144_v15  ;;  %v309_v6 = vcvt.s32.f32 %v307_v14 }
  0xfd   :  { %117 = vmin.xlane.f32.xlu2 %v116_v47 }
 0x101   :  { %v1142_v28 = vpop.xlane.xlu2 %183 }
 0x102   :  { %v1144_v35 = vpop.xlane.xlu1 %155  ;;  %v1146_v53 = vpop.xlane.xlu0 %127  ;;  %vm185_vm2 = vcmp.eq.f32.partialorder %v971_v36, %v1142_v28  ;;  %v190_v7 = vcvt.f32.s32 %v1142_v28 }
 0x103   :  { %vm157_vm3 = vcmp.eq.f32.partialorder %v973_v37, %v1144_v35  ;;  %v186_v26 = vsel %vm185_vm2, %v181_v40, inf  ;;  %vm129_vm4 = vcmp.eq.f32.partialorder %v975_v38, %v1146_v53 }
 0x104   :  { %v158_v2 = vsel %vm157_vm3, %v153_v25, inf  ;;  %187 = vmin.xlane.f32.xlu0 %v186_v26  ;;  %v130_v31 = vsel %vm129_vm4, %v125_v30, inf }
 0x105   :  { %159 = vmin.xlane.f32.xlu2 %v158_v2  ;;  %131 = vmin.xlane.f32.xlu1 %v130_v31  ;;  %v148_v31 = vcvt.f32.s32 %v1131_v27 }
 0x107   :  { %v1243_v18 = vshll.u32 %v148_v31, 16 }
 0x109   :  { %v1157_v36 = vpop.xlane.xlu2 %241 }
 0x10a   :  { %v1159_v37 = vpop.xlane.xlu1 %197  ;;  %v1161_v8 = vpop.xlane.xlu0 %169  ;;  %vm243_vm5 = vcmp.eq.f32.partialorder %v1007_v49, %v1157_v36 }
 0x10b   :  { %vm199_vm6 = vcmp.eq.f32.partialorder %v1011_v51, %v1159_v37  ;;  %v244_v38 = vsel %vm243_vm5, %v239_v10, inf  ;;  %vm171_vm7 = vcmp.eq.f32.partialorder %v1009_v50, %v1161_v8  ;;  %v162_v10 = vcvt.f32.s32 %v1144_v35 }
 0x10c   :  { %v200_v42 = vsel %vm199_vm6, %v195_v41, inf  ;;  %245 = vmin.xlane.f32.xlu0 %v244_v38  ;;  %v172_v39 = vsel %vm171_vm7, %v167_v43, inf  ;;  %v134_v41 = vcvt.f32.s32 %v1146_v53  ;;  %v248_v38 = vcvt.f32.s32 %v1157_v36 }
 0x10d   :  { %201 = vmin.xlane.f32.xlu2 %v200_v42  ;;  %173 = vmin.xlane.f32.xlu1 %v172_v39  ;;  %v204_v43 = vcvt.f32.s32 %v1159_v37  ;;  %v176_v27 = vcvt.f32.s32 %v1161_v8  ;;  %v1245_v42 = vshll.u32 %v120_v32, 16  ;;  %v1254_v53 = vshll.u32 %v190_v7, 16 }
 0x10e   :  { %v1256_v36 = vshll.u32 %v162_v10, 16 }
 0x111   :  { %v1172_v49 = vpop.xlane.xlu2 %269 }
 0x112   :  { %v1174_v51 = vpop.xlane.xlu1 %255  ;;  %v1176_v17 = vpop.xlane.xlu0 %211  ;;  %vm271_vm8 = vcmp.eq.f32.partialorder %v1039_v61, %v1172_v49  ;;  %v276_v39 = vcvt.f32.s32 %v1172_v49  ;;  %v1264_v49 = vshll.u32 %v134_v41, 16 }
 0x113   :  { %vm257_vm9 = vcmp.eq.f32.partialorder %v1044_v63, %v1174_v51  ;;  %v272_v50 = vsel %vm271_vm8, %v267_v29, inf  ;;  %vm213_vm10 = vcmp.eq.f32.partialorder %v1036_v59, %v1176_v17  ;;  %v281_v63 = vcvt.s32.f32 %v279_v11 }
 0x114   :  { %v258_v13 = vsel %vm257_vm9, %v253_v9, inf  ;;  %273 = vmin.xlane.f32.xlu0 %v272_v50  ;;  %v214_v48 = vsel %vm213_vm10, %v209_v56, inf  ;;  %v262_v37 = vcvt.f32.s32 %v1174_v51  ;;  %v218_v8 = vcvt.f32.s32 %v1176_v17 }
 0x115   :  { %259 = vmin.xlane.f32.xlu2 %v258_v13  ;;  %215 = vmin.xlane.f32.xlu1 %v214_v48  ;;  %v1266_v9 = vshll.u32 %v248_v38, 16  ;;  %v1272_v13 = vshll.u32 %v204_v43, 16  ;;  %v1274_v48 = vshll.u32 %v176_v27, 16  ;;  %v1278_v57 = vshll.u32 %v276_v39, 16 }
 0x119   :  { %v1196_v16 = vpop.xlane.xlu2 %311 }
 0x11a   :  { %v1186_v55 = vpop.xlane.xlu1 %297  ;;  %v1188_v61 = vpop.xlane.xlu0 %283  ;;  %vm313_vm13 = vcmp.eq.f32.partialorder %v1881_v0, %v1196_v16  ;;  %v318_v50 = vcvt.f32.s32 %v1196_v16 }
 0x11b   :  { %vm299_vm11 = vcmp.eq.f32.partialorder %v1079_v60, %v1186_v55  ;;  %vm285_vm12 = vcmp.eq.f32.partialorder %v1071_v46, %v1188_v61  ;;  %v337_v60 = vcvt.s32.f32 %v335_v1  ;;  %v323_v46 = vcvt.s32.f32 %v321_v23 }
 0x11c   :  { %v300_v59 = vsel %vm299_vm11, %v295_v33, inf  ;;  %v286_v62 = vsel %vm285_vm12, %v281_v63, inf  ;;  %v314_v47 = vsel %vm313_vm13, %v309_v6, inf  ;;  %v304_v51 = vcvt.f32.s32 %v1186_v55 }
 0x11d   :  { %301 = vmin.xlane.f32.xlu2 %v300_v59  ;;  %287 = vmin.xlane.f32.xlu1 %v286_v62  ;;  %v290_v17 = vcvt.f32.s32 %v1188_v61  ;;  %v1284_v63 = vshll.u32 %v262_v37, 16  ;;  %v1286_v59 = vshll.u32 %v218_v8, 16  ;;  %v1291_v1 = vshll.u32 %v318_v50, 16 }
 0x11e   :  { %v1297_v23 = vshll.u32 %v304_v51, 16 }
 0x11f   :  { %v1299_v16 = vshll.u32 %v290_v17, 16 }
 0x121   :  { %v1213_v4 = vpop.xlane.xlu2 %377 }
 0x122   :  { %v1199_v34 = vpop.xlane.xlu1 %339  ;;  %v1201_v19 = vpop.xlane.xlu0 %325  ;;  %762 = vrcp.f32 %v1213_v4  ;;  %v468_v11 = vand.u32 2147483647, %v1213_v4  ;;  %v470_v62 = vand.u32 2147483648, %v1213_v4  ;;  %vm464_vm0 = vweird.f32 %v1213_v4 }
 0x123   :  { %vm341_vm14 = vcmp.eq.f32.partialorder %v1101_v58, %v1199_v34  ;;  %vm327_vm15 = vcmp.eq.f32.partialorder %v1098_v3, %v1201_v19  ;;  %v346_v61 = vcvt.f32.s32 %v1199_v34  ;;  %v332_v24 = vcvt.f32.s32 %v1201_v19 }
 0x124   :  { %v342_v20 = vsel %vm341_vm14, %v337_v60, inf  ;;  %v328_v15 = vsel %vm327_vm15, %v323_v46, inf  ;;  %vm1307_vm2 = vcmp.eq.f32.partialorder %v468_v11, 8.507059e+37  ;;  %v471_v46 = vor.u32 1.1754944e-38, %v470_v62 }
 0x125   :  { %343 = vmin.xlane.f32.xlu0 %v342_v20  ;;  %329 = vmin.xlane.f32.xlu2 %v328_v15  ;;  %v1313_v15 = vshll.u32 %v346_v61, 16  ;;  %v1327_v10 = vshll.u32 %v332_v24, 16 }
 0x126   :  { %315 = vmin.xlane.f32.xlu1 %v314_v47 }
 0x128   :  { %v1228_v2 = vpop.eup %762 }
 0x129   :  { %v1219_v58 = vpop.xlane.xlu2 %383  ;;  %v460_v44 = vmul.f32 %v1228_v2, %v1213_v4  ;;  %vm465_vm1 = vweird.f32 %v1228_v2 }
 0x12a   :  { %v1209_v21 = vpop.xlane.xlu0 %373  ;;  %v1215_v40 = vpop.xlane.xlu1 %375  ;;  %764 = vrcp.f32 %v1219_v58  ;;  %v515_v6 = vand.u32 2147483648, %v1219_v58  ;;  %vm1323_vm3 = vmor %vm464_vm0, %vm465_vm1  ;;  %vm509_vm4 = vweird.f32 %v1219_v58  ;;  %v513_v41 = vand.u32 2147483647, %v1219_v58 }
 0x12b   :  { %766 = vrcp.f32 %v1215_v40  ;;  %v461_v45 = vsub.f32 1.0, %v460_v44  ;;  %v455_v19 = vand.u32 2147483648, %v1215_v40  ;;  %v440_v31 = vand.u32 2147483648, %v1209_v21 }
 0x12c   :  { %768 = vrcp.f32 %v1209_v21  ;;  %v438_v37 = vand.u32 2147483647, %v1209_v21  ;;  %v516_v8 = vor.u32 1.1754944e-38, %v515_v6  ;;  %vm449_vm5 = vweird.f32 %v1215_v40 }
 0x12d   :  { %v462_v52 = vmul.f32 %v1228_v2, %v461_v45  ;;  %v453_v45 = vand.u32 2147483647, %v1215_v40  ;;  %vm434_vm6 = vweird.f32 %v1209_v21  ;;  %v456_v51 = vor.u32 1.1754944e-38, %v455_v19 }
 0x12e   :  { %vm1355_vm8 = vcmp.eq.f32.partialorder %v513_v41, 8.507059e+37  ;;  %vm1368_vm12 = vcmp.eq.f32.partialorder %v438_v37, 8.507059e+37 }
 0x12f   :  { %v463_v60 = vadd.f32 %v1228_v2, %v462_v52  ;;  %v441_v52 = vor.u32 1.1754944e-38, %v440_v31  ;;  %vm1363_vm10 = vcmp.eq.f32.partialorder %v453_v45, 8.507059e+37 }
 0x130   :  { %v1252_v54 = vpop.eup %764 }
 0x131   :  { %v1226_v30 = vpop.xlane.xlu2 %413  ;;  %v1262_v29 = vpop.eup %766  ;;  %v505_v33 = vmul.f32 %v1252_v54, %v1219_v58  ;;  %v467_v4 = vsel %vm1323_vm3, %v1228_v2, %v463_v60  ;;  %vm510_vm7 = vweird.f32 %v1252_v54 }
 0x132   :  { %v1211_v22 = vpop.xlane.xlu0 %379  ;;  %v1222_v3 = vpop.xlane.xlu1 %381  ;;  %770 = vrcp.f32 %v1226_v30  ;;  %v445_v55 = vmul.f32 %v1262_v29, %v1215_v40  ;;  %v560_v11 = vand.u32 2147483648, %v1226_v30  ;;  %vm450_vm9 = vweird.f32 %v1262_v29  ;;  %vm1387_vm14 = vmor %vm509_vm4, %vm510_vm7 }
 0x133   :  { %v1270_v56 = vpop.eup %768  ;;  %772 = vrcp.f32 %v1222_v3  ;;  %v506_v0 = vsub.f32 1.0, %v505_v33  ;;  %v1352_v33 = vsel %vm1307_vm2, %v471_v46, %v467_v4  ;;  %v500_v34 = vand.u32 2147483648, %v1222_v3  ;;  %vm1400_vm15 = vmor %vm449_vm5, %vm450_vm9 }
 0x134   :  { %v430_v12 = vmul.f32 %v1270_v56, %v1209_v21  ;;  %v446_v20 = vsub.f32 1.0, %v445_v55  ;;  %774 = vrcp.f32 %v1211_v22  ;;  %vm435_vm11 = vweird.f32 %v1270_v56 }
 0x135   :  { %v507_v39 = vmul.f32 %v1252_v54, %v506_v0  ;;  %vm554_vm13 = vweird.f32 %v1226_v30  ;;  %v558_v46 = vand.u32 2147483647, %v1226_v30  ;;  %v498_v6 = vand.u32 2147483647, %v1222_v3  ;;  %vm1416_vm0 = vmor %vm434_vm6, %vm435_vm11 }
 0x136   :  { %v431_v47 = vsub.f32 1.0, %v430_v12  ;;  %v447_v50 = vmul.f32 %v1262_v29, %v446_v20  ;;  %v1378_v19 = vor.u32 1.1754944e-38, %v560_v11  ;;  %v1404_v37 = vor.u32 1.1754944e-38, %v500_v34 }
 0x137   :  { %v508_v12 = vadd.f32 %v1252_v54, %v507_v39  ;;  %vm1421_vm2 = vcmp.eq.f32.partialorder %v558_v46, 8.507059e+37  ;;  %vm494_vm3 = vweird.f32 %v1222_v3  ;;  %vm685_vm4 = vcmask 7168  }
 0x138   :  { %v1303_v14 = vpop.eup %770  ;;  %v432_v17 = vmul.f32 %v1270_v56, %v431_v47  ;;  %v448_v0 = vadd.f32 %v1262_v29, %v447_v50  ;;  %vm479_vm5 = vweird.f32 %v1211_v22  ;;  %vm1455_vm7 = vcmp.eq.f32.partialorder %v498_v6, 8.507059e+37 }
 0x139   :  { %v1260_v5 = vpop.xlane.xlu2 %419  ;;  %v550_v38 = vmul.f32 %v1303_v14, %v1226_v30  ;;  %v1335_v27 = vpop.eup %772  ;;  %v512_v45 = vsel %vm1387_vm14, %v1252_v54, %v508_v12  ;;  %vm555_vm1 = vweird.f32 %v1303_v14  ;;  %vm702_vm14 = vcmask 15368  }
 0x13a   :  { %v1217_v25 = vpop.xlane.xlu0 %385  ;;  %v1248_v28 = vpop.xlane.xlu1 %387  ;;  %v490_v61 = vmul.f32 %v1335_v27, %v1222_v3  ;;  %v433_v20 = vadd.f32 %v1270_v56, %v432_v17  ;;  %v452_v11 = vsel %vm1400_vm15, %v1262_v29, %v448_v0  ;;  %vm495_vm6 = vweird.f32 %v1335_v27 }
 0x13b   :  { %v1348_v2 = vpop.eup %774  ;;  %v551_v55 = vsub.f32 1.0, %v550_v38  ;;  %v1448_v7 = vsel %vm1363_vm10, %v456_v51, %v452_v11  ;;  %v603_v60 = vand.u32 2147483647, %v1260_v5  ;;  %v545_v11 = vand.u32 2147483648, %v1248_v28  ;;  %vm1509_vm10 = vmor %vm494_vm3, %vm495_vm6 }
 0x13c   :  { %v475_v47 = vmul.f32 %v1348_v2, %v1211_v22  ;;  %v491_v38 = vsub.f32 1.0, %v490_v61  ;;  %v437_v21 = vsel %vm1416_vm0, %v1270_v56, %v433_v20  ;;  %v483_v56 = vand.u32 2147483647, %v1211_v22 }
 0x13d   :  { %v552_v41 = vmul.f32 %v1303_v14, %v551_v55  ;;  %v485_v55 = vand.u32 2147483648, %v1211_v22  ;;  %v605_v20 = vand.u32 2147483648, %v1260_v5  ;;  %vm480_vm9 = vweird.f32 %v1348_v2 }
 0x13e   :  { %v476_v61 = vsub.f32 1.0, %v475_v47  ;;  %v492_v0 = vmul.f32 %v1335_v27, %v491_v38  ;;  %vm1536_vm11 = vmor %vm479_vm5, %vm480_vm9  ;;  %vm599_vm15 = vweird.f32 %v1260_v5  ;;  %vm711_vm3 = vcmask 23568  }
 0x13f   :  { %v553_v34 = vadd.f32 %v1303_v14, %v552_v41  ;;  %v1452_v41 = vsel %vm1368_vm12, %v441_v52, %v437_v21  ;;  %v1459_v62 = vor.u32 1.1754944e-38, %v485_v55  ;;  %vm1655_vm9 = vcmp.eq.f32.partialorder %v603_v60, 8.507059e+37 }
 0x140   :  { %v477_v52 = vmul.f32 %v1348_v2, %v476_v61  ;;  %v493_v38 = vadd.f32 %v1335_v27, %v492_v0 }
 0x141   :  { %v1333_v43 = vpop.xlane.xlu2 %425 }
 0x142   :  { %v1224_v26 = vpop.xlane.xlu0 %415  ;;  %v1317_v32 = vpop.xlane.xlu1 %417 }
 0x143   :  { %776 = vrcp.f32 %v1224_v26  ;;  %v588_v0 = vand.u32 2147483647, %v1317_v32  ;;  %vm569_vm0 = vweird.f32 %v1224_v26  ;;  %vm584_vm5 = vweird.f32 %v1317_v32 }
 0x144   :  { %778 = vrcp.f32 %v1260_v5 }
 0x145   :  { %780 = vrcp.f32 %v1317_v32 }
 0x146   :  { %782 = vrcp.f32 %v1248_v28 }
 0x14a   :  { %v1250_v35 = vpop.xlane.xlu0 %421  ;;  %v1407_v50 = vpop.xlane.xlu1 %423 }
 0x14b   :  { %784 = vrcp.f32 %v1250_v35 }
 0x14c   :  { %786 = vrcp.f32 %v1217_v25 }
 0x14d   :  { %788 = vrcp.f32 %v1333_v43 }
 0x14e   :  { %790 = vrcp.f32 %v1407_v50 }
 0x152   :  { %v1319_v44 = vpop.xlane.xlu0 %427 }
 0x153   :  { %792 = vrcp.f32 %v1319_v44 }
 0x16f   :  { %v146_v31 = vpop.xlane.xlu0 %145 }
 0x170   :  { %v118_v4 = vpop.xlane.xlu2 %117  ;;  %v147_v39 = vcvt.f32.s32 %v146_v31  ;;  %v1435_v31 = vpop.eup %776 }
 0x171   :  { %v119_v17 = vcvt.f32.s32 %v118_v4  ;;  %v1444_v47 = vpop.eup %778  ;;  %v565_v4 = vmul.f32 %v1435_v31, %v1224_v26 }
 0x172   :  { %v150_v29 = vadd.s32 %v1243_v18, %v147_v39  ;;  %v1439_v18 = vsel %vm1355_vm8, %v516_v8, %v512_v45  ;;  %v1465_v24 = vpop.eup %780  ;;  %vm1471_vm8 = vmor %vm554_vm13, %vm555_vm1  ;;  %v595_v58 = vmul.f32 %v1444_v47, %v1260_v5  ;;  %vm600_vm12 = vweird.f32 %v1444_v47 }
 0x173   :  { %v122_v12 = vadd.s32 %v1245_v42, %v119_v17  ;;  %v557_v30 = vsel %vm1471_vm8, %v1303_v14, %v553_v34  ;;  %v1491_v17 = vor.u32 1.1754944e-38, %v605_v20  ;;  %v580_v21 = vmul.f32 %v1465_v24, %v1317_v32 }
 0x174   :  { %v679_v46 = vcvt.s32.f32 %v150_v29  ;;  %v1494_v29 = vpop.eup %782  ;;  %v1503_v34 = vsel %vm1421_vm2, %v1378_v19, %v557_v30  ;;  %v497_v19 = vsel %vm1509_vm10, %v1335_v27, %v493_v38  ;;  %v566_v54 = vsub.f32 1.0, %v565_v4 }
 0x175   :  { %v677_v42 = vcvt.s32.f32 %v122_v12  ;;  %v1522_v3 = vpop.eup %784  ;;  %v596_v51 = vsub.f32 1.0, %v595_v58  ;;  %v581_v27 = vsub.f32 1.0, %v580_v21  ;;  %v1548_v4 = vsel %vm1455_vm7, %v1404_v37, %v497_v19 }
 0x176   :  { %688 = vst.msk [vmem:[%s1869_s2 + $0x10] sm:$0xff] %vm685_vm4, %v679_v46  ;;  %v1514_v46 = vadd.f32 %v1348_v2, %v477_v52  ;;  %v1528_v52 = vor.u32 1.1754944e-38, %v545_v11  ;;  %v530_v58 = vand.u32 2147483648, %v1217_v25  ;;  %v610_v37 = vmul.f32 %v1522_v3, %v1250_v35  ;;  %v1568_v21 = vpop.eup %786 }
 0x177   :  { %686 = vst.msk [vmem:[%s1869_s2] sm:$0xff] %vm685_vm4, %v677_v42  ;;  %v188_v6 = vpop.xlane.xlu0 %187  ;;  %vm570_vm13 = vweird.f32 %v1435_v31  ;;  %vm1592_vm1 = vcmp.eq.f32.partialorder %v483_v56, 8.507059e+37  ;;  %vm585_vm2 = vweird.f32 %v1465_v24  ;;  %v1607_v22 = vmul.f32 %v1568_v21, %v1217_v25 }
 0x178   :  { %v160_v39 = vpop.xlane.xlu2 %159  ;;  %v189_v45 = vcvt.f32.s32 %v188_v6  ;;  %v132_v55 = vpop.xlane.xlu1 %131  ;;  %v1526_v6 = vmul.f32 %v1494_v29, %v1248_v28  ;;  %vm1616_vm6 = vmor %vm569_vm0, %vm570_vm13  ;;  %vm1624_vm7 = vcmp.eq.f32.partialorder %v588_v0, 8.507059e+37  ;;  %vm615_vm13 = vweird.f32 %v1522_v3 }
 0x179   :  { %v161_v40 = vcvt.f32.s32 %v160_v39  ;;  %v133_v61 = vcvt.f32.s32 %v132_v55  ;;  %v482_v39 = vsel %vm1536_vm11, %v1348_v2, %v1514_v46  ;;  %vm1640_vm8 = vmor %vm584_vm5, %vm585_vm2  ;;  %vm614_vm2 = vweird.f32 %v1250_v35 }
 0x17a   :  { %v192_v12 = vadd.s32 %v1254_v53, %v189_v45  ;;  %vm1676_vm0 = vmor %vm599_vm15, %vm600_vm12  ;;  %v1695_v5 = vsel %vm1592_vm1, %v1459_v62, %v482_v39  ;;  %vm644_vm12 = vweird.f32 %v1333_v43  ;;  %vm524_vm11 = vweird.f32 %v1217_v25 }
 0x17b   :  { %v164_v53 = vadd.s32 %v1256_v36, %v161_v40  ;;  %v136_v20 = vadd.s32 %v1264_v49, %v133_v61  ;;  %v669_v36 = vmin.f32 %v1452_v41, %v1503_v34  ;;  %v567_v40 = vmul.f32 %v1435_v31, %v566_v54  ;;  %vm1705_vm15 = vmor %vm614_vm2, %vm615_vm13 }
 0x17c   :  { %v682_v42 = vcvt.s32.f32 %v192_v12  ;;  %v597_v61 = vmul.f32 %v1444_v47, %v596_v51  ;;  %v536_v12 = vsub.f32 1.0, %v1526_v6  ;;  %v582_v54 = vmul.f32 %v1465_v24, %v581_v27 }
 0x17d   :  { %v680_v30 = vcvt.s32.f32 %v164_v53  ;;  %v678_v38 = vcvt.s32.f32 %v136_v20  ;;  %v590_v20 = vand.u32 2147483648, %v1317_v32  ;;  %vm540_vm1 = vweird.f32 %v1494_v29 }
 0x17e   :  { %691 = vst.msk [vmem:[%s1869_s2 + $0x28] sm:$0xff] %vm685_vm4, %v682_v42  ;;  %vm525_vm5 = vweird.f32 %v1568_v21  ;;  %vm629_vm13 = vweird.f32 %v1407_v50 }
 0x17f   :  { %689 = vst.msk [vmem:[%s1869_s2 + $0x18] sm:$0xff] %vm685_vm4, %v680_v30  ;;  %v246_v11 = vpop.xlane.xlu0 %245 }
 0x180   :  { %687 = vst.msk [vmem:[%s1869_s2 + $0x8] sm:$0xff] %vm685_vm4, %v678_v38  ;;  %v202_v8 = vpop.xlane.xlu2 %201  ;;  %v247_v55 = vcvt.f32.s32 %v246_v11  ;;  %v174_v19 = vpop.xlane.xlu1 %173  ;;  %v568_v11 = vadd.f32 %v1435_v31, %v567_v40 }
 0x181   :  { %v203_v53 = vcvt.f32.s32 %v202_v8  ;;  %v175_v42 = vcvt.f32.s32 %v174_v19  ;;  %v1580_v38 = vpop.eup %788  ;;  %v611_v8 = vsub.f32 1.0, %v610_v37  ;;  %v1603_v37 = vadd.f32 %v1444_v47, %v597_v61 }
 0x182   :  { %v250_v30 = vadd.s32 %v1266_v9, %v247_v55  ;;  %v573_v9 = vand.u32 2147483647, %v1224_v26  ;;  %v575_v55 = vand.u32 2147483648, %v1224_v26  ;;  %v1588_v45 = vpop.eup %790  ;;  %v640_v56 = vmul.f32 %v1580_v38, %v1333_v43 }
 0x183   :  { %v206_v51 = vadd.s32 %v1272_v13, %v203_v53  ;;  %v178_v27 = vadd.s32 %v1274_v48, %v175_v42  ;;  %v583_v48 = vadd.f32 %v1465_v24, %v582_v54  ;;  %v572_v32 = vsel %vm1616_vm6, %v1435_v31, %v568_v11 }
 0x184   :  { %v694_v14 = vcvt.s32.f32 %v250_v30  ;;  %v612_v26 = vmul.f32 %v1522_v3, %v611_v8  ;;  %v1636_v30 = vpop.eup %792  ;;  %v625_v31 = vmul.f32 %v1588_v45, %v1407_v50  ;;  %vm574_vm10 = vcmp.eq.f32.partialorder %v573_v9, 8.507059e+37 }
 0x185   :  { %v683_v19 = vcvt.s32.f32 %v206_v51  ;;  %v681_v40 = vcvt.s32.f32 %v178_v27  ;;  %v591_v51 = vor.u32 1.1754944e-38, %v590_v20  ;;  %v576_v27 = vor.u32 1.1754944e-38, %v575_v55 }
 0x186   :  { %703 = vst.msk [vmem:[%s1869_s2] sm:$0xff] %vm702_vm14, %v694_v14  ;;  %v587_v20 = vsel %vm1640_vm8, %v1465_v24, %v583_v48  ;;  %v641_v34 = vsub.f32 1.0, %v640_v56  ;;  %v613_v53 = vadd.f32 %v1522_v3, %v612_v26  ;;  %v655_v60 = vmul.f32 %v1636_v30, %v1319_v44 }
 0x187   :  { %692 = vst.msk [vmem:[%s1869_s2 + $0x30] sm:$0xff] %vm685_vm4, %v683_v19  ;;  %v274_v14 = vpop.xlane.xlu0 %273  ;;  %v592_v24 = vsel %vm1624_vm7, %v591_v51, %v587_v20  ;;  %v626_v9 = vsub.f32 1.0, %v625_v31  ;;  %v648_v13 = vand.u32 2147483647, %v1333_v43  ;;  %vm645_vm7 = vweird.f32 %v1580_v38 }
 0x188   :  { %690 = vst.msk [vmem:[%s1869_s2 + $0x20] sm:$0xff] %vm685_vm4, %v681_v40  ;;  %v260_v54 = vpop.xlane.xlu2 %259  ;;  %v275_v42 = vcvt.f32.s32 %v274_v14  ;;  %v216_v8 = vpop.xlane.xlu1 %215  ;;  %v577_v40 = vsel %vm574_vm10, %v576_v27, %v572_v32  ;;  %v642_v2 = vmul.f32 %v1580_v38, %v641_v34  ;;  %v671_v62 = vmin.f32 %v1352_v33, %v592_v24  ;;  %vm1761_vm10 = vmor %vm644_vm12, %vm645_vm7 }
 0x189   :  { %712 = vst.msk [vmem:[%s1869_s2] sm:$0xff] %vm711_vm3, %v669_v36  ;;  %v261_v11 = vcvt.f32.s32 %v260_v54  ;;  %v217_v55 = vcvt.f32.s32 %v216_v8  ;;  %v670_v56 = vmin.f32 %v1448_v7, %v577_v40  ;;  %v521_v7 = vsub.f32 1.0, %v1607_v22  ;;  %vm1797_vm12 = vmor %vm524_vm11, %vm525_vm5 }
 0x18a   :  { %v278_v41 = vadd.s32 %v1278_v57, %v275_v42  ;;  %v620_v57 = vand.u32 2147483648, %v1250_v35  ;;  %v656_v46 = vsub.f32 1.0, %v655_v60  ;;  %v537_v32 = vmul.f32 %v1494_v29, %v536_v12 }
 0x18b   :  { %v264_v36 = vadd.s32 %v1284_v63, %v261_v11  ;;  %v220_v14 = vadd.s32 %v1286_v59, %v217_v55  ;;  %v618_v59 = vand.u32 2147483647, %v1250_v35  ;;  %v602_v35 = vsel %vm1676_vm0, %v1444_v47, %v1603_v37 }
 0x18c   :  { %v696_v54 = vcvt.s32.f32 %v278_v41  ;;  %v617_v47 = vsel %vm1705_vm15, %v1522_v3, %v613_v53  ;;  %v627_v37 = vmul.f32 %v1588_v45, %v626_v9  ;;  %v621_v22 = vor.u32 1.1754944e-38, %v620_v57 }
 0x18d   :  { %v695_v48 = vcvt.s32.f32 %v264_v36  ;;  %v684_v61 = vcvt.s32.f32 %v220_v14  ;;  %vm619_vm6 = vcmp.eq.f32.partialorder %v618_v59, 8.507059e+37  ;;  %v607_v42 = vsel %vm1655_vm9, %v1491_v17, %v602_v35 }
 0x18e   :  { %705 = vst.msk [vmem:[%s1869_s2 + $0x10] sm:$0xff] %vm702_vm14, %v696_v54  ;;  %v522_v0 = vmul.f32 %v1568_v21, %v521_v7  ;;  %v622_v6 = vsel %vm619_vm6, %v621_v22, %v617_v47  ;;  %v643_v51 = vadd.f32 %v1580_v38, %v642_v2  ;;  %v657_v27 = vmul.f32 %v1636_v30, %v656_v46 }
 0x18f   :  { %704 = vst.msk [vmem:[%s1869_s2 + $0x8] sm:$0xff] %vm702_vm14, %v695_v48  ;;  %v650_v11 = vand.u32 2147483648, %v1333_v43  ;;  %v628_v8 = vadd.f32 %v1588_v45, %v627_v37  ;;  %vm630_vm8 = vweird.f32 %v1588_v45  ;;  %vm1751_vm9 = vcmp.eq.f32.partialorder %v648_v13, 8.507059e+37 }
 0x190   :  { %713 = vst.msk [vmem:[%s1869_s2 + $0x8] sm:$0xff] %vm711_vm3, %v670_v56  ;;  %v302_v39 = vpop.xlane.xlu2 %301  ;;  %v288_v3 = vpop.xlane.xlu1 %287  ;;  %v673_v20 = vmin.f32 %v1548_v4, %v622_v6  ;;  %v672_v41 = vmin.f32 %v1695_v5, %v607_v42  ;;  %v633_v40 = vand.u32 2147483647, %v1407_v50  ;;  %v523_v4 = vadd.f32 %v1568_v21, %v522_v0  ;;  %vm1775_vm0 = vmor %vm629_vm13, %vm630_vm8 }
 0x191   :  { %693 = vst.msk [vmem:[%s1869_s2 + $0x38] sm:$0xff] %vm685_vm4, %v684_v61  ;;  %v303_v33 = vcvt.f32.s32 %v302_v39  ;;  %v289_v26 = vcvt.f32.s32 %v288_v3  ;;  %vm539_vm4 = vweird.f32 %v1248_v28  ;;  %v647_v36 = vsel %vm1761_vm10, %v1580_v38, %v643_v51 }
 0x192   :  { %714 = vst.msk [vmem:[%s1869_s2 + $0x10] sm:$0xff] %vm711_vm3, %v671_v62  ;;  %v658_v53 = vadd.f32 %v1636_v30, %v657_v27  ;;  %vm660_vm2 = vweird.f32 %v1636_v30  ;;  %v632_v14 = vsel %vm1775_vm0, %v1588_v45, %v628_v8  ;;  %v665_v38 = vand.u32 2147483648, %v1319_v44  ;;  %vm1826_vm11 = vmor %vm539_vm4, %vm540_vm1 }
 0x193   :  { %v306_v12 = vadd.s32 %v1297_v23, %v303_v33  ;;  %v292_v31 = vadd.s32 %v1299_v16, %v289_v26  ;;  %v635_v23 = vand.u32 2147483648, %v1407_v50  ;;  %v538_v16 = vadd.f32 %v1494_v29, %v537_v32 }
 0x194   :  { %vm659_vm15 = vweird.f32 %v1319_v44  ;;  %v663_v45 = vand.u32 2147483647, %v1319_v44  ;;  %v651_v56 = vor.u32 1.1754944e-38, %v650_v11  ;;  %vm634_vm6 = vcmp.eq.f32.partialorder %v633_v40, 8.507059e+37 }
 0x195   :  { %v698_v17 = vcvt.s32.f32 %v306_v12  ;;  %v697_v55 = vcvt.s32.f32 %v292_v31  ;;  %v636_v48 = vor.u32 1.1754944e-38, %v635_v23  ;;  %vm1809_vm7 = vmor %vm659_vm15, %vm660_vm2  ;;  %v527_v44 = vsel %vm1797_vm12, %v1568_v21, %v523_v4 }
 0x196   :  { %v662_v7 = vsel %vm1809_vm7, %v1636_v30, %v658_v53  ;;  %v666_v21 = vor.u32 1.1754944e-38, %v665_v38  ;;  %v1934_v30 = vand.u32 2147483647, %v1217_v25  ;;  %vm664_vm8 = vcmp.eq.f32.partialorder %v663_v45, 8.507059e+37 }
 0x197   :  { %707 = vst.msk [vmem:[%s1869_s2 + $0x20] sm:$0xff] %vm702_vm14, %v698_v17  ;;  %v637_v35 = vsel %vm634_vm6, %v636_v48, %v632_v14  ;;  %v1935_v37 = vand.u32 2147483647, %v1248_v28 }
 0x198   :  { %716 = vst.msk [vmem:[%s1869_s2 + $0x20] sm:$0xff] %vm711_vm3, %v673_v20  ;;  %v330_v50 = vpop.xlane.xlu2 %329  ;;  %v344_v60 = vpop.xlane.xlu0 %343  ;;  %vm529_vm5 = vcmp.eq.f32.partialorder %v1934_v30, 8.507059e+37  ;;  %v674_v39 = vmin.f32 %v1439_v18, %v637_v35  ;;  %v667_v13 = vsel %vm664_vm8, %v666_v21, %v662_v7 }
 0x199   :  { %706 = vst.msk [vmem:[%s1869_s2 + $0x18] sm:$0xff] %vm702_vm14, %v697_v55  ;;  %v316_v54 = vpop.xlane.xlu1 %315  ;;  %v331_v24 = vcvt.f32.s32 %v330_v50  ;;  %v345_v9 = vcvt.f32.s32 %v344_v60  ;;  %vm544_vm1 = vcmp.eq.f32.partialorder %v1935_v37, 8.507059e+37 }
 0x19a   :  { %715 = vst.msk [vmem:[%s1869_s2 + $0x18] sm:$0xff] %vm711_vm3, %v672_v41  ;;  %v317_v63 = vcvt.f32.s32 %v316_v54 }
 0x19b   :  { %v334_v61 = vadd.s32 %v1327_v10, %v331_v24  ;;  %v348_v5 = vadd.s32 %v1313_v15, %v345_v9  ;;  %v531_v15 = vor.u32 1.1754944e-38, %v530_v58  ;;  %v652_v10 = vsel %vm1751_vm9, %v651_v56, %v647_v36 }
 0x19c   :  { %v320_v49 = vadd.s32 %v1291_v1, %v317_v63  ;;  %v542_v1 = vsel %vm1826_vm11, %v1494_v29, %v538_v16 }
 0x19d   :  { %v700_v62 = vcvt.s32.f32 %v334_v61  ;;  %v532_v46 = vsel %vm529_vm5, %v531_v15, %v527_v44  ;;  %v701_v58 = vcvt.s32.f32 %v348_v5  ;;  %v547_v25 = vsel %vm544_vm1, %v1528_v52, %v542_v1 }
 0x19e   :  { %v699_v47 = vcvt.s32.f32 %v320_v49  ;;  %v675_v22 = vmin.f32 %v532_v46, %v652_v10  ;;  %v676_v18 = vmin.f32 %v547_v25, %v667_v13 }
 0x19f   :  { %709 = vst.msk [vmem:[%s1869_s2 + $0x30] sm:$0xff] %vm702_vm14, %v700_v62 }
 0x1a0   :  { %708 = vst.msk [vmem:[%s1869_s2 + $0x28] sm:$0xff] %vm702_vm14, %v699_v47 }
 0x1a1   :  { %717 = vst.msk [vmem:[%s1869_s2 + $0x28] sm:$0xff] %vm711_vm3, %v674_v39 }
 0x1a2   :  { %718 = vst.msk [vmem:[%s1869_s2 + $0x30] sm:$0xff] %vm711_vm3, %v675_v22 }
 0x1a3   :  { %710 = vst.msk [vmem:[%s1869_s2 + $0x38] sm:$0xff] %vm702_vm14, %v701_v58 }
 0x1a4   :  { %719 = vst.msk [vmem:[%s1869_s2 + $0x38] sm:$0xff] %vm711_vm3, %v676_v18 }
 0x1a5   :  { %724 = vsyncpa [#allocation3], 1 }
 0x1a6   :  { %725 = vsyncpa [#allocation5], 1 }

</bundles_post_ra>
